<compile_context>
chip_gen: v7x
topology: tpu7x:2x2x1
jax: 0.10.0
libtpu: 0.0.40
codegen_flags: <defaults>
</compile_context>

<pallas_src>
import functools
import math

import jax
import jax.numpy as jnp
from jax.experimental import pallas as pl
from jax.experimental.pallas import tpu as pltpu


_HAS_BUFFERED = hasattr(pl, "Buffered")


def _spec(block_shape, index_map, buffers=None):
    """BlockSpec helper; `buffers` requests an explicit pipeline buffer count."""
    if buffers is not None and _HAS_BUFFERED:
        try:
            return pl.BlockSpec(block_shape, index_map,
                                pipeline_mode=pl.Buffered(buffers))
        except TypeError:          # pipeline_mode kwarg unavailable -> default
            pass
    return pl.BlockSpec(block_shape, index_map)


def _ffn_resident_kernel(x_ref, w1_ref, b1_ref, w2_ref, b2_ref, o_ref):
    # Weights fully VMEM-resident: one fused pass per row tile.
    x = x_ref[...]
    h = jnp.dot(x, w1_ref[...], preferred_element_type=jnp.float32) + b1_ref[...]
    h = jnp.maximum(h, 0.0)                                   # ReLU
    # dropout (eval mode) == identity
    y = jnp.dot(h.astype(w2_ref.dtype), w2_ref[...],
                preferred_element_type=jnp.float32) + b2_ref[...]
    o_ref[...] = y.astype(o_ref.dtype)


def _ffn_stream_kernel(x_ref, w1_ref, b1_ref, w2_ref, b2_ref, o_ref, *scratch):
    # F-streaming path.  Accumulate directly into the resident f32 output block
    # when possible, otherwise into the trailing f32 VMEM scratch ref.
    acc_ref = scratch[0] if scratch else o_ref
    j = pl.program_id(1)

    x = x_ref[...]
    h = jnp.dot(x, w1_ref[...], preferred_element_type=jnp.float32) + b1_ref[...]
    h = jnp.maximum(h, 0.0)                                   # ReLU
    # dropout (eval mode) == identity
    contrib = jnp.dot(h.astype(w2_ref.dtype), w2_ref[...],
                      preferred_element_type=jnp.float32)

    @pl.when(j == 0)
    def _():
        acc_ref[...] = contrib

    @pl.when(j != 0)
    def _():
        acc_ref[...] += contrib

    @pl.when(j == pl.num_programs(1) - 1)
    def _():
        o_ref[...] = (acc_ref[...] + b2_ref[...]).astype(o_ref.dtype)


def _round_up(x, m):
    return (x + m - 1) // m * m


def _pad2d(a, shape, dtype):
    a = a.astype(dtype)
    if tuple(a.shape) == tuple(shape):
        return a
    return jnp.zeros(shape, dtype).at[: a.shape[0], : a.shape[1]].set(a)


def _vmem_budget_bytes():
    """~75% of this generation's per-TC VMEM (96 MiB v5e/v6e, 48 MiB v7x)."""
    cap = 64 * 1024 * 1024          # conservative fallback (v7x physical)
    try:
        cap = int(pltpu.get_tpu_info().vmem_capacity_bytes)
    except Exception:
        pass
    return (cap * 3) // 4


@functools.partial(jax.jit,
                   static_argnames=("tm_target", "tf_target", "compute_dtype"))
def feedforward_block(x, w1, b1, w2, b2, *, tm_target=512, tf_target=1024,
                      compute_dtype=jnp.bfloat16):
    """FeedForwardBlock forward: Linear -> ReLU -> Dropout(eval) -> Linear.

    x: (..., D); w1: (D, F); b1: (F,); w2: (F, D); b2: (D,).
    """
    assert tm_target % 16 == 0 and tf_target % 128 == 0
    *lead, D = x.shape
    F = w1.shape[1]
    M = math.prod(lead) if lead else 1
    out_dtype = x.dtype
    cdt_size = jnp.dtype(compute_dtype).itemsize
    out_size = jnp.dtype(out_dtype).itemsize

    x2 = x.reshape(M, D)

    # lane-dense padding (zero padding is exact: ReLU(0)=0, zero rows/cols add 0)
    D_pad = _round_up(D, 128)
    F_pad = _round_up(F, 128)

    # --- row-tile selection (multiples of 16: bf16 sublane packing) ----------
    tm = max(16, min(tm_target, _round_up(M, 16)))
    M_pad = _round_up(M, tm)
    # v7x has two TensorCores; give the "parallel" row axis >= 2 tiles.
    while (M_pad // tm) < 2 and tm >= 32:
        tm = max(16, _round_up(tm // 2, 16))
        M_pad = _round_up(M, tm)

    budget = _vmem_budget_bytes()
    wbuf = 1 if _HAS_BUFFERED else 2        # weight buffer count, resident path

    # --- path selection -------------------------------------------------------
    resident_bytes = (
        wbuf * 2 * D_pad * F_pad * cdt_size          # W1 + W2, VMEM-resident
        + wbuf * (F_pad + D_pad) * 4                 # biases (f32)
        + 2 * tm * D_pad * cdt_size                  # x tile (double-buffered)
        + 2 * tm * D_pad * out_size                  # out tile (double-buffered)
        + tm * F_pad * 4                             # hidden activation (f32)
        + tm * D_pad * 4)                            # f32 result before cast
    use_resident = resident_bytes <= budget

    x_p = _pad2d(x2, (M_pad, D_pad), compute_dtype)

    if use_resident:
        # ---------------- weight-resident path (no F grid axis) --------------
        w1_p = _pad2d(w1, (D_pad, F_pad), compute_dtype)
        w2_p = _pad2d(w2, (F_pad, D_pad), compute_dtype)
        b1_p = _pad2d(b1.reshape(1, F), (1, F_pad), jnp.float32)
        b2_p = _pad2d(b2.reshape(1, D), (1, D_pad), jnp.float32)

        grid = (M_pad // tm,)
        cost = pl.CostEstimate(
            flops=2 * 2 * M_pad * D_pad * F_pad,
            transcendentals=0,
            bytes_accessed=(M_pad * D_pad * cdt_size            # x
                            + 2 * D_pad * F_pad * cdt_size      # W1 + W2 (once)
                            + (F_pad + D_pad) * 4               # biases
                            + M_pad * D_pad * out_size))        # out

        out_p = pl.pallas_call(
            _ffn_resident_kernel,
            out_shape=jax.ShapeDtypeStruct((M_pad, D_pad), out_dtype),
            grid_spec=pltpu.PrefetchScalarGridSpec(
                num_scalar_prefetch=0,
                grid=grid,
                in_specs=[
                    _spec((tm, D_pad), lambda i: (i, 0)),                # x rows
                    _spec((D_pad, F_pad), lambda i: (0, 0), buffers=1),  # W1
                    _spec((1, F_pad), lambda i: (0, 0), buffers=1),      # b1
                    _spec((F_pad, D_pad), lambda i: (0, 0), buffers=1),  # W2
                    _spec((1, D_pad), lambda i: (0, 0), buffers=1),      # b2
                ],
                out_specs=pl.BlockSpec((tm, D_pad), lambda i: (i, 0)),
            ),
            compiler_params=pltpu.CompilerParams(
                dimension_semantics=("parallel",),
                vmem_limit_bytes=budget,
            ),
            cost_estimate=cost,
        )(x_p, w1_p, b1_p, w2_p, b2_p)
    else:
        # ---------------- F-streaming fallback (huge hidden dim) -------------
        tf = min(tf_target, F_pad)

        def _stream_bytes(tm_, tf_):
            return (2 * tm_ * D_pad * cdt_size               # x (dbl-buffered)
                    + 2 * 2 * D_pad * tf_ * cdt_size         # W1 + W2 tiles
                    + 2 * (tf_ + D_pad) * 4                  # biases
                    + 2 * tm_ * D_pad * out_size             # out
                    + tm_ * D_pad * 4                        # accumulator
                    + tm_ * tf_ * 4)                         # hidden activation

        while _stream_bytes(tm, tf) > budget and tf > 256:
            tf = max(256, _round_up(tf // 2, 128))
        while _stream_bytes(tm, tf) > budget and tm > 32:
            tm = max(16, _round_up(tm // 2, 16))
            M_pad = _round_up(M, tm)
            x_p = _pad2d(x2, (M_pad, D_pad), compute_dtype)

        F_pad = _round_up(F_pad, tf)
        grid = (M_pad // tm, F_pad // tf)

        w1_p = _pad2d(w1, (D_pad, F_pad), compute_dtype)
        w2_p = _pad2d(w2, (F_pad, D_pad), compute_dtype)
        b1_p = _pad2d(b1.reshape(1, F), (1, F_pad), jnp.float32)
        b2_p = _pad2d(b2.reshape(1, D), (1, D_pad), jnp.float32)

        # accumulate straight into the resident output block when it is f32
        acc_in_out = jnp.dtype(out_dtype) == jnp.dtype(jnp.float32)
        scratch_shapes = [] if acc_in_out else [pltpu.VMEM((tm, D_pad), jnp.float32)]

        cost = pl.CostEstimate(
            flops=2 * 2 * M_pad * D_pad * F_pad,
            transcendentals=0,
            bytes_accessed=(M_pad * D_pad * cdt_size
                            # W1/W2 (and b1) are re-streamed once per row tile:
                            + grid[0] * 2 * D_pad * F_pad * cdt_size
                            + grid[0] * F_pad * 4 + D_pad * 4
                            + M_pad * D_pad * out_size))

        out_p = pl.pallas_call(
            _ffn_stream_kernel,
            out_shape=jax.ShapeDtypeStruct((M_pad, D_pad), out_dtype),
            grid_spec=pltpu.PrefetchScalarGridSpec(
                num_scalar_prefetch=0,
                grid=grid,
                in_specs=[
                    _spec((tm, D_pad), lambda i, j: (i, 0)),            # x rows
                    _spec((D_pad, tf), lambda i, j: (0, j)),            # W1 cols
                    _spec((1, tf), lambda i, j: (0, j)),                # b1 tile
                    _spec((tf, D_pad), lambda i, j: (j, 0)),            # W2 rows
                    _spec((1, D_pad), lambda i, j: (0, 0), buffers=1),  # b2
                ],
                out_specs=pl.BlockSpec((tm, D_pad), lambda i, j: (i, 0)),
                scratch_shapes=scratch_shapes,
            ),
            compiler_params=pltpu.CompilerParams(
                dimension_semantics=("parallel", "arbitrary"),
                vmem_limit_bytes=budget,
            ),
            cost_estimate=cost,
        )(x_p, w1_p, b1_p, w2_p, b2_p)

    return out_p[:M, :D].reshape(*lead, D)


def init_params(key, model_dim, ff_dim, dtype=jnp.float32):
    """nn.Linear-style U(-1/sqrt(fan_in), 1/sqrt(fan_in)) init, stored (in, out)."""
    k1, k2, k3, k4 = jax.random.split(key, 4)
    bound1 = 1.0 / math.sqrt(model_dim)
    bound2 = 1.0 / math.sqrt(ff_dim)
    w1 = jax.random.uniform(k1, (model_dim, ff_dim), dtype, -bound1, bound1)
    b1 = jax.random.uniform(k2, (ff_dim,), dtype, -bound1, bound1)
    w2 = jax.random.uniform(k3, (ff_dim, model_dim), dtype, -bound2, bound2)
    b2 = jax.random.uniform(k4, (model_dim,), dtype, -bound2, bound2)
    return w1, b1, w2, b2


if __name__ == "__main__":
    key = jax.random.PRNGKey(0)
    batch, seq, model_dim, ff_dim = 2, 8, 32, 64
    dropout_rate = 0.1  # eval-mode dropout == identity

    kx, kp = jax.random.split(key)
    x = jax.random.normal(kx, (batch, seq, model_dim), jnp.float32)
    w1, b1, w2, b2 = init_params(kp, model_dim, ff_dim)

    out = feedforward_block(x, w1, b1, w2, b2)
    jax.block_until_ready(out)
    assert out.shape == (batch, seq, model_dim)

    # reference: same bf16-compute / f32-accumulate path in plain JAX
    xr = x.reshape(-1, model_dim).astype(jnp.bfloat16)
    h = jnp.maximum(
        jnp.dot(xr, w1.astype(jnp.bfloat16), preferred_element_type=jnp.float32)
        + b1, 0.0)
    ref = (jnp.dot(h.astype(jnp.bfloat16), w2.astype(jnp.bfloat16),
                   preferred_element_type=jnp.float32)
           + b2).reshape(batch, seq, model_dim)

    assert jnp.allclose(out, ref, atol=1e-3, rtol=1e-3), "mismatch vs reference"

    print("KERNEL_OK")
</pallas_src>

<mosaic_0001>
module attributes {stable_mosaic.version = 11 : i64} {
  func.func @_ffn_resident_kernel(%arg0: i32, %arg1: memref<16x128xbf16, #tpu.memory_space<vmem>>, %arg2: memref<128x128xbf16, #tpu.memory_space<vmem>>, %arg3: memref<1x128xf32, #tpu.memory_space<vmem>>, %arg4: memref<128x128xbf16, #tpu.memory_space<vmem>>, %arg5: memref<1x128xf32, #tpu.memory_space<vmem>>, %arg6: memref<16x128xf32, #tpu.memory_space<vmem>>) attributes {dimension_semantics = [#tpu.dimension_semantics<parallel>], iteration_bounds = array<i64: 1>, scalar_prefetch = 0 : i64, scratch_operands = 0 : i64, tpu.core_type = #tpu.core_type<tc>, window_params = [{transform_indices = @transform_0, window_bounds = array<i64: 16, 128>}, {pipeline_mode = #tpu.pipeline_mode<synchronous>, transform_indices = @transform_1, window_bounds = array<i64: 128, 128>}, {pipeline_mode = #tpu.pipeline_mode<synchronous>, transform_indices = @transform_2, window_bounds = array<i64: 1, 128>}, {pipeline_mode = #tpu.pipeline_mode<synchronous>, transform_indices = @transform_3, window_bounds = array<i64: 128, 128>}, {pipeline_mode = #tpu.pipeline_mode<synchronous>, transform_indices = @transform_4, window_bounds = array<i64: 1, 128>}, {transform_indices = @transform_5, window_bounds = array<i64: 16, 128>}]} {
    %c0 = arith.constant 0 : index
    %c0_0 = arith.constant 0 : index
    %0 = vector.load %arg1[%c0, %c0_0] : memref<16x128xbf16, #tpu.memory_space<vmem>>, vector<16x128xbf16>
    %c0_1 = arith.constant 0 : index
    %c0_2 = arith.constant 0 : index
    %1 = vector.load %arg2[%c0_1, %c0_2] : memref<128x128xbf16, #tpu.memory_space<vmem>>, vector<128x128xbf16>
    %cst = arith.constant dense<0.000000e+00> : vector<16x128xf32>
    %2 = tpu.matmul %0, %1, %cst {dimension_numbers = #tpu.dot_dimension_numbers<[1], [0], [0], [1], [0, 0, 1, 1], [], []>} : vector<16x128xbf16>, vector<128x128xbf16>, vector<16x128xf32> -> vector<16x128xf32>
    %c0_3 = arith.constant 0 : index
    %c0_4 = arith.constant 0 : index
    %3 = vector.load %arg3[%c0_3, %c0_4] : memref<1x128xf32, #tpu.memory_space<vmem>>, vector<1x128xf32>
    %4 = vector.broadcast %3 : vector<1x128xf32> to vector<16x128xf32>
    %5 = arith.addf %2, %4 : vector<16x128xf32>
    %cst_5 = arith.constant 0.000000e+00 : f32
    %6 = vector.broadcast %cst_5 : f32 to vector<16x128xf32>
    %7 = arith.maximumf %5, %6 : vector<16x128xf32>
    %8 = arith.truncf %7 : vector<16x128xf32> to vector<16x128xbf16>
    %c0_6 = arith.constant 0 : index
    %c0_7 = arith.constant 0 : index
    %9 = vector.load %arg4[%c0_6, %c0_7] : memref<128x128xbf16, #tpu.memory_space<vmem>>, vector<128x128xbf16>
    %cst_8 = arith.constant dense<0.000000e+00> : vector<16x128xf32>
    %10 = tpu.matmul %8, %9, %cst_8 {dimension_numbers = #tpu.dot_dimension_numbers<[1], [0], [0], [1], [0, 0, 1, 1], [], []>} : vector<16x128xbf16>, vector<128x128xbf16>, vector<16x128xf32> -> vector<16x128xf32>
    %c0_9 = arith.constant 0 : index
    %c0_10 = arith.constant 0 : index
    %11 = vector.load %arg5[%c0_9, %c0_10] : memref<1x128xf32, #tpu.memory_space<vmem>>, vector<1x128xf32>
    %12 = vector.broadcast %11 : vector<1x128xf32> to vector<16x128xf32>
    %13 = arith.addf %10, %12 : vector<16x128xf32>
    %c0_11 = arith.constant 0 : index
    %c0_12 = arith.constant 0 : index
    %14 = vector.load %arg6[%c0_11, %c0_12] : memref<16x128xf32, #tpu.memory_space<vmem>>, vector<16x128xf32>
    tpu.vector_store %arg6[%c0_11, %c0_12], %13 {strides = array<i32>} : memref<16x128xf32, #tpu.memory_space<vmem>>, vector<16x128xf32>,
    return
  }
  func.func @transform_0(%arg0: i32) -> (i32, i32) {
    %c0_i32 = arith.constant 0 : i32
    %c0_i32_0 = arith.constant 0 : i32
    return %arg0, %c0_i32 : i32, i32
  }
  func.func @transform_1(%arg0: i32) -> (i32, i32) {
    %c0_i32 = arith.constant 0 : i32
    %c0_i32_0 = arith.constant 0 : i32
    %c0_i32_1 = arith.constant 0 : i32
    return %c0_i32, %c0_i32_0 : i32, i32
  }
  func.func @transform_2(%arg0: i32) -> (i32, i32) {
    %c0_i32 = arith.constant 0 : i32
    %c0_i32_0 = arith.constant 0 : i32
    %c0_i32_1 = arith.constant 0 : i32
    return %c0_i32, %c0_i32_0 : i32, i32
  }
  func.func @transform_3(%arg0: i32) -> (i32, i32) {
    %c0_i32 = arith.constant 0 : i32
    %c0_i32_0 = arith.constant 0 : i32
    %c0_i32_1 = arith.constant 0 : i32
    return %c0_i32, %c0_i32_0 : i32, i32
  }
  func.func @transform_4(%arg0: i32) -> (i32, i32) {
    %c0_i32 = arith.constant 0 : i32
    %c0_i32_0 = arith.constant 0 : i32
    %c0_i32_1 = arith.constant 0 : i32
    return %c0_i32, %c0_i32_0 : i32, i32
  }
  func.func @transform_5(%arg0: i32) -> (i32, i32) {
    %c0_i32 = arith.constant 0 : i32
    %c0_i32_0 = arith.constant 0 : i32
    return %arg0, %c0_i32 : i32, i32
  }
}

</mosaic_0001>

<bundles_post_ra>
// kernel: feedforward_block.1
= control target key start
LH: loop header
LB: loop body
LE: loop exit
PB: predicated region body
PF: predicated region fallthrough
CT: control target
= control target key end

     0   :  { %v358_v0 = vmov 0.0   ;;  %vm359_vm0 = vmmov 0   ;;  %s453_s1 = inlined_call_operand.vmem [shape: bf16[128,128], index: 1, kind: input, shape index: {}]   ;;  %s454_s3 = inlined_call_operand.vmem [shape: bf16[128,128], index: 3, kind: input, shape index: {}]   ;;  %s455_s0 = inlined_call_operand.vmem [shape: bf16[16,128], index: 0, kind: input, shape index: {}]   ;;  %s456_s2 = inlined_call_operand.vmem [shape: f32[1,128], index: 2, kind: input, shape index: {}]   ;;  %s457_s4 = inlined_call_operand.vmem [shape: f32[1,128], index: 4, kind: input, shape index: {}]   ;;  %s458_s5 = inlined_call_operand.vmem [shape: f32[16,128], index: 5, kind: output, shape index: {}]  }
   0x1   :  { %299 = vmatprep.subr.bf16.mxu0 %v358_v0  ;;  %v341_v1 = vld [vmem:[%s453_s1] sm:$0xff]   ;;  %315 = vmatprep.mubr.msk.bf16.mxu0 %vm359_vm0, %v358_v0  ;;  %v342_v2 = vld [vmem:[%s453_s1 + $0x8] sm:$0xff]   ;;  %v343_v3 = vld [vmem:[%s453_s1 + $0x10] sm:$0xff]  }
   0x2   :  { %319 = vmatprep.subr.bf16.mxu1 %v358_v0  ;;  %335 = vmatprep.mubr.msk.bf16.mxu1 %vm359_vm0, %v358_v0  ;;  %v350_v4 = vld [vmem:[%s454_s3] sm:$0xff]   ;;  %v344_v5 = vld [vmem:[%s453_s1 + $0x18] sm:$0xff]   ;;  %v351_v6 = vld [vmem:[%s454_s3 + $0x8] sm:$0xff]  }
   0x3   :  { %300 = vmatpush3.bf16.msra.mxu0 %v341_v1  ;;  %320 = vmatpush3.bf16.msra.mxu1 %v350_v4  ;;  %v345_v7 = vld [vmem:[%s453_s1 + $0x20] sm:$0xff]   ;;  %v352_v8 = vld [vmem:[%s454_s3 + $0x10] sm:$0xff]   ;;  %v346_v9 = vld [vmem:[%s453_s1 + $0x28] sm:$0xff]  }
   0x4   :  { %301 = vmatprep.subr.bf16.mxu0 %v358_v0  ;;  %321 = vmatprep.subr.bf16.mxu1 %v358_v0  ;;  %v353_v10 = vld [vmem:[%s454_s3 + $0x18] sm:$0xff]   ;;  %v347_v11 = vld [vmem:[%s453_s1 + $0x30] sm:$0xff]   ;;  %v354_v12 = vld [vmem:[%s454_s3 + $0x20] sm:$0xff]  }
   0x5   :  { %v348_v13 = vld [vmem:[%s453_s1 + $0x38] sm:$0xff]   ;;  %v355_v14 = vld [vmem:[%s454_s3 + $0x28] sm:$0xff]   ;;  %v349_v15 = vld [vmem:[%s455_s0] sm:$0xff]  }
   0x6   :  { %v356_v16 = vld [vmem:[%s454_s3 + $0x30] sm:$0xff]   ;;  %v357_v17 = vld [vmem:[%s454_s3 + $0x38] sm:$0xff]   ;;  %v262_v18 = vld [vmem:[%s456_s2] ss:$0 sm:$0xff] }
   0x7   :  { %302 = vmatpush3.bf16.msra.mxu0 %v342_v2  ;;  %322 = vmatpush3.bf16.msra.mxu1 %v351_v6  ;;  %v272_v28 = vld [vmem:[%s457_s4] ss:$0 sm:$0xff] }
   0x8   :  { %303 = vmatprep.subr.bf16.mxu0 %v358_v0  ;;  %323 = vmatprep.subr.bf16.mxu1 %v358_v0 }
   0xb   :  { %304 = vmatpush3.bf16.msra.mxu0 %v343_v3  ;;  %324 = vmatpush3.bf16.msra.mxu1 %v352_v8 }
   0xc   :  { %305 = vmatprep.subr.bf16.mxu0 %v358_v0  ;;  %325 = vmatprep.subr.bf16.mxu1 %v358_v0 }
   0xf   :  { %306 = vmatpush3.bf16.msra.mxu0 %v344_v5  ;;  %326 = vmatpush3.bf16.msra.mxu1 %v353_v10 }
  0x10   :  { %307 = vmatprep.subr.bf16.mxu0 %v358_v0  ;;  %327 = vmatprep.subr.bf16.mxu1 %v358_v0 }
  0x13   :  { %308 = vmatpush3.bf16.msra.mxu0 %v345_v7  ;;  %328 = vmatpush3.bf16.msra.mxu1 %v354_v12 }
  0x14   :  { %309 = vmatprep.subr.bf16.mxu0 %v358_v0  ;;  %329 = vmatprep.subr.bf16.mxu1 %v358_v0 }
  0x17   :  { %310 = vmatpush3.bf16.msra.mxu0 %v346_v9  ;;  %330 = vmatpush3.bf16.msra.mxu1 %v355_v14 }
  0x18   :  { %311 = vmatprep.subr.bf16.mxu0 %v358_v0  ;;  %331 = vmatprep.subr.bf16.mxu1 %v358_v0 }
  0x1b   :  { %312 = vmatpush3.bf16.msra.mxu0 %v347_v11  ;;  %332 = vmatpush3.bf16.msra.mxu1 %v356_v16 }
  0x1c   :  { %313 = vmatprep.subr.bf16.mxu0 %v358_v0  ;;  %333 = vmatprep.subr.bf16.mxu1 %v358_v0 }
  0x1f   :  { %314 = vmatpush3.bf16.msra.mxu0 %v348_v13  ;;  %334 = vmatpush3.bf16.msra.mxu1 %v357_v17 }
  0x22   :  { %316 = vmatmul.mubr.bf16.vlgmr.msra.gmra.mrb[0].mxu0 %v349_v15 }
  0xf5   :  { %v134_v19 = vpop.f32.mrb[0].mxu0 }
  0xf6   :  { %v135_v20 = vadd.f32 %v262_v18, %v134_v19  ;;  %v317_v21 = vpop.f32.mrb[1].mxu0 }
  0xf7   :  { %v137_v22 = vpop.f32.mrb[2].mxu0 }
  0xf8   :  { %v138_v23 = vadd.f32 %v262_v18, %v137_v22  ;;  %v318_v24 = vpop.f32.mrb[3].mxu0  ;;  %v141_v25 = vmax.f32 %v135_v20, 0.0 }
  0xfa   :  { %v142_v26 = vmax.f32 %v138_v23, 0.0 }
  0xfc   :  { %v143_v27 = vpack.c.bf16 %v142_v26, %v141_v25 }
  0xfe   :  { %336 = vmatmul.mubr.bf16.vlgmr.msra.gmra.mrb[0].mxu1 %v143_v27 }
 0x1d1   :  { %v249_v29 = vpop.f32.mrb[0].mxu1 }
 0x1d2   :  { %v250_v30 = vadd.f32 %v272_v28, %v249_v29  ;;  %v337_v31 = vpop.f32.mrb[1].mxu1 }
 0x1d3   :  { %v252_v32 = vpop.f32.mrb[2].mxu1 }
 0x1d4   :  { %256 = vst [vmem:[%s458_s5] sm:$0xff] %v250_v30  ;;  %v253_v33 = vadd.f32 %v272_v28, %v252_v32  ;;  %v338_v34 = vpop.f32.mrb[3].mxu1 }
 0x1d6   :  { %257 = vst [vmem:[%s458_s5 + $0x8] sm:$0xff] %v253_v33 }

</bundles_post_ra>
